<compile_context>
chip_gen: v7x
topology: tpu7x:2x2x1
jax: 0.10.0
libtpu: 0.0.40
codegen_flags: <defaults>
</compile_context>

<pallas_src>
import functools

import jax
import jax.numpy as jnp
from jax.experimental import pallas as pl
from jax.experimental.pallas import tpu as pltpu

LANE = 128            # vreg lane width
SUBL = 8              # sublanes per vreg
N_SUB = 4             # independent (8,128) sub-accumulators per quantity
ACC_ROWS = N_SUB * SUBL          # 32 rows per quantity in the accumulator
NEG_PAD = -1.0e30     # sigmoid(NEG_PAD) == 0 exactly


def _device_defaults():
    """(block_rows, n_split) per TPU generation; conservative fallback."""
    kind = ""
    try:
        kind = jax.devices()[0].device_kind.lower()
    except Exception:
        pass
    if "v7" in kind or "7x" in kind:
        return 8192, 2        # 4 MiB/input block, split across 2 TensorCores
    if "v6" in kind:
        return 4096, 1        # 2 MiB/input block
    return 2048, 1            # v5e / unknown: 1 MiB/input block


def _round_up(a, b):
    return pl.cdiv(a, b) * b


def _dice_sums_kernel(x_ref, t_ref, acc_ref, *, nblocks, block_rows):
    """Accumulates [sum(sig*t); sum(sig); sum(t)] into a resident (1,96,128)
    f32 accumulator per core.  No per-element masking: padding already
    guarantees pad elements contribute zero; only clamped duplicate tail
    blocks are skipped via pl.when."""
    c = pl.program_id(0)                 # core-split axis ("parallel")
    i = pl.program_id(1)                 # reduction axis ("arbitrary")
    steps = pl.num_programs(1)

    @pl.when(i == 0)
    def _():
        acc_ref[...] = jnp.zeros_like(acc_ref)

    @pl.when(c * steps + i < nblocks)    # skip clamped duplicate tail block
    def _():
        x = x_ref[...].astype(jnp.float32)
        t = t_ref[...].astype(jnp.float32)
        sig = jax.nn.sigmoid(x)          # EUP transcendental; pad rows -> 0

        def fold(v):
            # (block_rows,128) -> (32,128): pure VPU adds, 4 independent
            # 8-sublane chains so add latency is hidden.
            return jnp.sum(
                v.reshape(block_rows // ACC_ROWS, ACC_ROWS, LANE), axis=0)

        acc_ref[0, 0 * ACC_ROWS:1 * ACC_ROWS, :] += fold(sig * t)
        acc_ref[0, 1 * ACC_ROWS:2 * ACC_ROWS, :] += fold(sig)
        acc_ref[0, 2 * ACC_ROWS:3 * ACC_ROWS, :] += fold(t)


def dice_loss(inputs, targets, *, smooth=1.0):
    block_rows_max, n_split_max = _device_defaults()

    n = inputs.size
    x = inputs.reshape(-1)
    t = targets.reshape(-1)
    if not jnp.issubdtype(x.dtype, jnp.floating):
        x = x.astype(jnp.float32)        # logits are float; safeguard only

    # Rows needed to view the flat stream as (rows, 128).
    rows_needed = pl.cdiv(n, LANE)
    # Block rows: multiple of 32 (covers f32/bf16/int8 packing tiles) and no
    # larger than needed for small inputs.
    block_rows = min(block_rows_max, _round_up(rows_needed, ACC_ROWS))
    # Pad to a whole number of blocks: every grid block is fully in bounds.
    rows_padded = _round_up(rows_needed, block_rows)
    n_pad = rows_padded * LANE

    if n_pad != n:
        # x padded with a large negative value -> sigmoid(pad) == 0;
        # t padded with 0.  Pad elements contribute nothing to any sum.
        x = jnp.pad(x, (0, n_pad - n), constant_values=NEG_PAD)
        t = jnp.pad(t, (0, n_pad - n))
    x2 = x.reshape(rows_padded, LANE)
    t2 = t.reshape(rows_padded, LANE)

    nblocks = rows_padded // block_rows            # exact
    n_split = min(n_split_max, nblocks)            # 2 TCs on v7x, else 1
    steps = pl.cdiv(nblocks, n_split)

    def in_index(c, i):
        # Clamp so the trailing core never DMAs past the array; the clamped
        # duplicate block is skipped by the pl.when gate in the kernel.
        return (jnp.minimum(c * steps + i, nblocks - 1), 0)

    def out_index(c, i):
        return (c, 0, 0)

    in_spec = pl.BlockSpec((block_rows, LANE), in_index)
    acc_spec = pl.BlockSpec((1, 3 * ACC_ROWS, LANE), out_index)
    acc_shape = jax.ShapeDtypeStruct((n_split, 3 * ACC_ROWS, LANE),
                                     jnp.float32)

    kernel = functools.partial(_dice_sums_kernel,
                               nblocks=nblocks, block_rows=block_rows)

    acc = pl.pallas_call(
        kernel,
        grid=(n_split, steps),
        in_specs=[in_spec, in_spec],
        out_specs=acc_spec,
        out_shape=acc_shape,
        compiler_params=pltpu.CompilerParams(
            dimension_semantics=("parallel", "arbitrary"),
            vmem_limit_bytes=32 * 1024 * 1024,
        ),
    )(x2, t2)

    # Single tiny cross-lane reduction + dice formula in plain JAX.
    intersection = jnp.sum(acc[:, 0 * ACC_ROWS:1 * ACC_ROWS, :])
    s_total = jnp.sum(acc[:, 1 * ACC_ROWS:2 * ACC_ROWS, :])
    t_total = jnp.sum(acc[:, 2 * ACC_ROWS:3 * ACC_ROWS, :])
    dice = (2.0 * intersection + smooth) / (s_total + t_total + smooth)
    return 1.0 - dice


def _reference(inputs, targets, smooth=1.0):
    s = jax.nn.sigmoid(inputs.reshape(-1).astype(jnp.float32))
    t = targets.reshape(-1).astype(jnp.float32)
    inter = jnp.sum(s * t)
    dice = (2.0 * inter + smooth) / (jnp.sum(s) + jnp.sum(t) + smooth)
    return 1.0 - dice


if __name__ == "__main__":
    key = jax.random.PRNGKey(0)
    k1, k2 = jax.random.split(key)
    # NCHW-shaped logits and binary targets (the loss flattens them anyway).
    inputs = jax.random.normal(k1, (2, 4, 16, 16), dtype=jnp.float32)
    targets = (jax.random.uniform(k2, (2, 4, 16, 16)) > 0.5).astype(jnp.float32)

    loss_fn = jax.jit(dice_loss)
    out = jax.block_until_ready(loss_fn(inputs, targets))

    ref = _reference(inputs, targets)
    assert jnp.allclose(out, ref, rtol=1e-5, atol=1e-6), (out, ref)
    print("KERNEL_OK")
</pallas_src>

<mosaic_0001>
module attributes {stable_mosaic.version = 11 : i64} {
  func.func @_dice_sums_kernel(%arg0: i32, %arg1: i32, %arg2: memref<32x128xf32, #tpu.memory_space<vmem>>, %arg3: memref<32x128xf32, #tpu.memory_space<vmem>>, %arg4: memref<1x96x128xf32, #tpu.memory_space<vmem>>) attributes {dimension_semantics = [#tpu.dimension_semantics<parallel>, #tpu.dimension_semantics<arbitrary>], iteration_bounds = array<i64: 1, 1>, scalar_prefetch = 0 : i64, scratch_operands = 0 : i64, tpu.core_type = #tpu.core_type<tc>, window_params = [{transform_indices = @transform_0, window_bounds = array<i64: 32, 128>}, {transform_indices = @transform_1, window_bounds = array<i64: 32, 128>}, {transform_indices = @transform_2, window_bounds = array<i64: 1, 96, 128>}]} {
    %c0_i32 = arith.constant 0 : i32
    %0 = arith.cmpi eq, %arg1, %c0_i32 : i32
    %1 = arith.extui %0 : i1 to i32
    %c0_i32_0 = arith.constant 0 : i32
    %2 = arith.cmpi ne, %1, %c0_i32_0 : i32
    scf.if %2 {
      %cst = arith.constant 0.000000e+00 : f32
      %8 = vector.broadcast %cst : f32 to vector<1x96x128xf32>
      %c0 = arith.constant 0 : index
      %c0_3 = arith.constant 0 : index
      %c0_4 = arith.constant 0 : index
      %9 = vector.load %arg4[%c0, %c0_3, %c0_4] : memref<1x96x128xf32, #tpu.memory_space<vmem>>, vector<1x96x128xf32>
      tpu.vector_store %arg4[%c0, %c0_3, %c0_4], %8 {strides = array<i32>} : memref<1x96x128xf32, #tpu.memory_space<vmem>>, vector<1x96x128xf32>,
    } else {
    }
    %c1_i32 = arith.constant 1 : i32
    %3 = arith.muli %arg0, %c1_i32 : i32
    %4 = arith.addi %3, %arg1 : i32
    %c1_i32_1 = arith.constant 1 : i32
    %5 = arith.cmpi slt, %4, %c1_i32_1 : i32
    %6 = arith.extui %5 : i1 to i32
    %c0_i32_2 = arith.constant 0 : i32
    %7 = arith.cmpi ne, %6, %c0_i32_2 : i32
    scf.if %7 {
      %c0 = arith.constant 0 : index
      %c0_3 = arith.constant 0 : index
      %8 = vector.load %arg2[%c0, %c0_3] : memref<32x128xf32, #tpu.memory_space<vmem>>, vector<32x128xf32>
      %c0_4 = arith.constant 0 : index
      %c0_5 = arith.constant 0 : index
      %9 = vector.load %arg3[%c0_4, %c0_5] : memref<32x128xf32, #tpu.memory_space<vmem>>, vector<32x128xf32>
      %10 = arith.negf %8 : vector<32x128xf32>
      %11 = math.exp %10 : vector<32x128xf32>
      %cst = arith.constant 1.000000e+00 : f32
      %12 = vector.broadcast %cst : f32 to vector<32x128xf32>
      %13 = arith.addf %12, %11 : vector<32x128xf32>
      %14 = arith.divf %12, %13 : vector<32x128xf32>
      %c0_6 = arith.constant 0 : index
      %c0_7 = arith.constant 0 : index
      %c0_8 = arith.constant 0 : index
      %15 = vector.load %arg4[%c0_6, %c0_7, %c0_8] : memref<1x96x128xf32, #tpu.memory_space<vmem>>, vector<1x32x128xf32>
      %16 = vector.shape_cast %15 : vector<1x32x128xf32> to vector<32x128xf32>
      %17 = arith.mulf %14, %9 : vector<32x128xf32>
      %18 = vector.shape_cast %17 : vector<32x128xf32> to vector<1x32x128xf32>
      %cst_9 = arith.constant dense<0.000000e+00> : vector<32x128xf32>
      %19 = vector.multi_reduction <add>, %18, %cst_9 [0] : vector<1x32x128xf32> to vector<32x128xf32>
      %20 = arith.addf %16, %19 : vector<32x128xf32>
      %c0_10 = arith.constant 0 : index
      %c0_11 = arith.constant 0 : index
      %c0_12 = arith.constant 0 : index
      %21 = vector.load %arg4[%c0_10, %c0_11, %c0_12] : memref<1x96x128xf32, #tpu.memory_space<vmem>>, vector<1x32x128xf32>
      %22 = vector.shape_cast %21 : vector<1x32x128xf32> to vector<32x128xf32>
      %23 = vector.shape_cast %20 : vector<32x128xf32> to vector<1x32x128xf32>
      tpu.vector_store %arg4[%c0_10, %c0_11, %c0_12], %23 {strides = array<i32>} : memref<1x96x128xf32, #tpu.memory_space<vmem>>, vector<1x32x128xf32>,
      %c0_13 = arith.constant 0 : index
      %c32 = arith.constant 32 : index
      %c0_14 = arith.constant 0 : index
      %24 = vector.load %arg4[%c0_13, %c32, %c0_14] : memref<1x96x128xf32, #tpu.memory_space<vmem>>, vector<1x32x128xf32>
      %25 = vector.shape_cast %24 : vector<1x32x128xf32> to vector<32x128xf32>
      %26 = vector.shape_cast %14 : vector<32x128xf32> to vector<1x32x128xf32>
      %cst_15 = arith.constant dense<0.000000e+00> : vector<32x128xf32>
      %27 = vector.multi_reduction <add>, %26, %cst_15 [0] : vector<1x32x128xf32> to vector<32x128xf32>
      %28 = arith.addf %25, %27 : vector<32x128xf32>
      %c0_16 = arith.constant 0 : index
      %c32_17 = arith.constant 32 : index
      %c0_18 = arith.constant 0 : index
      %29 = vector.load %arg4[%c0_16, %c32_17, %c0_18] : memref<1x96x128xf32, #tpu.memory_space<vmem>>, vector<1x32x128xf32>
      %30 = vector.shape_cast %29 : vector<1x32x128xf32> to vector<32x128xf32>
      %31 = vector.shape_cast %28 : vector<32x128xf32> to vector<1x32x128xf32>
      tpu.vector_store %arg4[%c0_16, %c32_17, %c0_18], %31 {strides = array<i32>} : memref<1x96x128xf32, #tpu.memory_space<vmem>>, vector<1x32x128xf32>,
      %c0_19 = arith.constant 0 : index
      %c64 = arith.constant 64 : index
      %c0_20 = arith.constant 0 : index
      %32 = vector.load %arg4[%c0_19, %c64, %c0_20] : memref<1x96x128xf32, #tpu.memory_space<vmem>>, vector<1x32x128xf32>
      %33 = vector.shape_cast %32 : vector<1x32x128xf32> to vector<32x128xf32>
      %34 = vector.shape_cast %9 : vector<32x128xf32> to vector<1x32x128xf32>
      %cst_21 = arith.constant dense<0.000000e+00> : vector<32x128xf32>
      %35 = vector.multi_reduction <add>, %34, %cst_21 [0] : vector<1x32x128xf32> to vector<32x128xf32>
      %36 = arith.addf %33, %35 : vector<32x128xf32>
      %c0_22 = arith.constant 0 : index
      %c64_23 = arith.constant 64 : index
      %c0_24 = arith.constant 0 : index
      %37 = vector.load %arg4[%c0_22, %c64_23, %c0_24] : memref<1x96x128xf32, #tpu.memory_space<vmem>>, vector<1x32x128xf32>
      %38 = vector.shape_cast %37 : vector<1x32x128xf32> to vector<32x128xf32>
      %39 = vector.shape_cast %36 : vector<32x128xf32> to vector<1x32x128xf32>
      tpu.vector_store %arg4[%c0_22, %c64_23, %c0_24], %39 {strides = array<i32>} : memref<1x96x128xf32, #tpu.memory_space<vmem>>, vector<1x32x128xf32>,
    } else {
    }
    return
  }
  func.func @transform_0(%arg0: i32, %arg1: i32) -> (i32, i32) {
    %c1_i32 = arith.constant 1 : i32
    %0 = arith.muli %arg0, %c1_i32 : i32
    %1 = arith.addi %0, %arg1 : i32
    %c0_i32 = arith.constant 0 : i32
    %2 = arith.minsi %1, %c0_i32 : i32
    %c0_i32_0 = arith.constant 0 : i32
    %c0_i32_1 = arith.constant 0 : i32
    return %2, %c0_i32_0 : i32, i32
  }
  func.func @transform_1(%arg0: i32, %arg1: i32) -> (i32, i32) {
    %c1_i32 = arith.constant 1 : i32
    %0 = arith.muli %arg0, %c1_i32 : i32
    %1 = arith.addi %0, %arg1 : i32
    %c0_i32 = arith.constant 0 : i32
    %2 = arith.minsi %1, %c0_i32 : i32
    %c0_i32_0 = arith.constant 0 : i32
    %c0_i32_1 = arith.constant 0 : i32
    return %2, %c0_i32_0 : i32, i32
  }
  func.func @transform_2(%arg0: i32, %arg1: i32) -> (i32, i32, i32) {
    %c0_i32 = arith.constant 0 : i32
    %c0_i32_0 = arith.constant 0 : i32
    %c0_i32_1 = arith.constant 0 : i32
    return %arg0, %c0_i32, %c0_i32_0 : i32, i32, i32
  }
}

</mosaic_0001>

<bundles_post_ra>
// kernel: dice_loss.1
= control target key start
LH: loop header
LB: loop body
LE: loop exit
PB: predicated region body
PF: predicated region fallthrough
CT: control target
= control target key end

     0   :  { %s292_s0 = inlined_call_operand.vmem [shape: f32[32,128], index: 0, kind: input, shape index: {}]   ;;  %s293_s1 = inlined_call_operand.vmem [shape: f32[32,128], index: 1, kind: input, shape index: {}]   ;;  %s294_s2 = inlined_call_operand.vmem [shape: f32[1,96,128], index: 2, kind: output, shape index: {}]  }
   0x1   :  { %v96_v0 = vld [vmem:[%s292_s0] sm:$0xff]  ;;  %v97_v2 = vld [vmem:[%s292_s0 + $0x8] sm:$0xff]  ;;  %v98_v6 = vld [vmem:[%s292_s0 + $0x10] sm:$0xff] }
   0x2   :  { %v100_v1 = vld [vmem:[%s293_s1] sm:$0xff]  ;;  %v196_v3 = vmul.f32 -1.442695, %v96_v0  ;;  %v101_v4 = vld [vmem:[%s293_s1 + $0x8] sm:$0xff]  ;;  %v197_v5 = vmul.f32 -1.442695, %v97_v2 }
   0x3   :  { %v102_v7 = vld [vmem:[%s293_s1 + $0x10] sm:$0xff]  ;;  %v198_v8 = vmul.f32 -1.442695, %v98_v6  ;;  %v99_v9 = vld [vmem:[%s292_s0 + $0x18] sm:$0xff]  ;;  %176 = vst [vmem:[%s294_s2 + $0x40] sm:$0xff] %v100_v1  ;;  %177 = vst [vmem:[%s294_s2 + $0x48] sm:$0xff] %v101_v4 }
   0x4   :  { %v103_v10 = vld [vmem:[%s293_s1 + $0x18] sm:$0xff]  ;;  %201 = vpow2.f32 %v196_v3  ;;  %v199_v11 = vmul.f32 -1.442695, %v99_v9  ;;  %178 = vst [vmem:[%s294_s2 + $0x50] sm:$0xff] %v102_v7 }
   0x5   :  { %203 = vpow2.f32 %v197_v5  ;;  %179 = vst [vmem:[%s294_s2 + $0x58] sm:$0xff] %v103_v10 }
   0x6   :  { %205 = vpow2.f32 %v198_v8 }
   0x7   :  { %207 = vpow2.f32 %v199_v11 }
   0xe   :  { %v202_v12 = vpop.eup %201 }
   0xf   :  { %v204_v13 = vpop.eup %203  ;;  %v116_v14 = vadd.f32 1.0, %v202_v12 }
  0x10   :  { %v206_v15 = vpop.eup %205  ;;  %v117_v16 = vadd.f32 1.0, %v204_v13 }
  0x11   :  { %v208_v17 = vpop.eup %207  ;;  %209 = vrcp.f32 %v116_v14  ;;  %v118_v18 = vadd.f32 1.0, %v206_v15 }
  0x12   :  { %211 = vrcp.f32 %v117_v16  ;;  %v119_v19 = vadd.f32 1.0, %v208_v17 }
  0x13   :  { %213 = vrcp.f32 %v118_v18 }
  0x14   :  { %215 = vrcp.f32 %v119_v19 }
  0x1b   :  { %v210_v20 = vpop.eup %209 }
  0x1c   :  { %v212_v21 = vpop.eup %211  ;;  %v132_v22 = vmul.f32 %v210_v20, %v100_v1  ;;  %160 = vst [vmem:[%s294_s2 + $0x20] sm:$0xff] %v210_v20 }
  0x1d   :  { %v214_v23 = vpop.eup %213  ;;  %v133_v24 = vmul.f32 %v212_v21, %v101_v4  ;;  %161 = vst [vmem:[%s294_s2 + $0x28] sm:$0xff] %v212_v21 }
  0x1e   :  { %v216_v25 = vpop.eup %215  ;;  %v134_v26 = vmul.f32 %v214_v23, %v102_v7  ;;  %144 = vst [vmem:[%s294_s2] sm:$0xff] %v132_v22  ;;  %162 = vst [vmem:[%s294_s2 + $0x30] sm:$0xff] %v214_v23 }
  0x1f   :  { %v135_v27 = vmul.f32 %v216_v25, %v103_v10  ;;  %145 = vst [vmem:[%s294_s2 + $0x8] sm:$0xff] %v133_v24  ;;  %163 = vst [vmem:[%s294_s2 + $0x38] sm:$0xff] %v216_v25 }
  0x20   :  { %146 = vst [vmem:[%s294_s2 + $0x10] sm:$0xff] %v134_v26 }
  0x21   :  { %147 = vst [vmem:[%s294_s2 + $0x18] sm:$0xff] %v135_v27 }

</bundles_post_ra>
